<compile_context>
chip_gen: v6e
topology: v6e:2x2x1
jax: 0.10.0
libtpu: 0.0.40
codegen_flags: <defaults>
</compile_context>

<pallas_src>
import math
import jax
import jax.numpy as jnp
from jax import lax
from jax.experimental import pallas as pl
from jax.experimental.pallas import tpu as pltpu
import numpy as np

# ----------------------------- config (small) --------------------------------
B, S, H = 2, 8, 32          # batch, seq_len, hidden_size
NH = 4                      # num_attention_heads
HN = H // NH                # hidden_size_per_attention_head
EPS = 1e-5                  # layernorm_epsilon
INV_SQRT_HN = 1.0 / math.sqrt(HN)


# ------------------------------ kernel helpers -------------------------------
def _layer_norm(v, w, b):
    # v: (S, D) f32 ; w, b: (1, D)
    mu = jnp.sum(v, axis=-1, keepdims=True) * (1.0 / H)
    d = v - mu
    var = jnp.sum(d * d, axis=-1, keepdims=True) * (1.0 / H)
    return d * lax.rsqrt(var + EPS) * w + b


def _gelu(v):
    # SwissArmyTransformer / Megatron tanh-approximate gelu.
    return 0.5 * v * (1.0 + jnp.tanh(0.7978845608028654 * v * (1.0 + 0.044715 * v * v)))


# --------------------------------- kernel ------------------------------------
def transformer_layer_kernel(
    x_ref,        # (1, S, H)
    mask_ref,     # (S, S)
    vecs_ref,     # (10, H): ln1_w, ln1_b, ln3_w, ln3_b, ln2_w, ln2_b, ln4_w, ln4_b, bdense, b2
    wqkv_ref,     # (3*NH, H, HN)  per-head, (in, out) orientation
    bqkv_ref,     # (3*NH, 1, HN)
    wdense_ref,   # (NH, HN, H)    per-head, (in, out) orientation
    w1_ref,       # (H, 4H)
    b1_ref,       # (1, 4H)
    w2_ref,       # (4H, H)
    out_ref,      # (1, S, H)
):
    x = x_ref[0]                      # (S, H) f32
    mask = mask_ref[...]              # (S, S) f32
    vecs = vecs_ref[...]              # (10, H)

    ln1_w, ln1_b = vecs[0:1], vecs[1:2]
    ln3_w, ln3_b = vecs[2:3], vecs[3:4]
    ln2_w, ln2_b = vecs[4:5], vecs[5:6]
    ln4_w, ln4_b = vecs[6:7], vecs[7:8]
    bdense, b2 = vecs[8:9], vecs[9:10]

    # ---- input layernorm ----
    ln1_out = _layer_norm(x, ln1_w, ln1_b)

    # ---- self attention (head axis kept on the leading / major dimension) ----
    xb = jnp.broadcast_to(ln1_out, (3 * NH, S, H))
    qkv_h = lax.dot_general(xb, wqkv_ref[...],
                            (((2,), (1,)), ((0,), (0,))),
                            preferred_element_type=jnp.float32)       # (3NH, S, HN)
    qkv_h = qkv_h + bqkv_ref[...]

    q = qkv_h[0 * NH:1 * NH] * INV_SQRT_HN                            # (NH, S, HN)
    k = qkv_h[1 * NH:2 * NH]
    v = qkv_h[2 * NH:3 * NH]

    scores = lax.dot_general(q, k, (((2,), (2,)), ((0,), (0,))),
                             preferred_element_type=jnp.float32)      # (NH, S, S)
    neg_bias = -10000.0 * (1.0 - mask)                                # once, not per head
    scores = scores * mask + neg_bias
    scores = scores - jnp.max(scores, axis=-1, keepdims=True)
    p = jnp.exp(scores)
    p = p * pl.reciprocal(jnp.sum(p, axis=-1, keepdims=True))         # exact reciprocal

    ctx = lax.dot_general(p, v, (((2,), (1,)), ((0,), (0,))),
                          preferred_element_type=jnp.float32)         # (NH, S, HN)

    # Output projection with the head re-merge folded in: per-head partials,
    # summed over the (major) head axis — no transpose / concatenate.
    partial = lax.dot_general(ctx, wdense_ref[...],
                              (((2,), (1,)), ((0,), (0,))),
                              preferred_element_type=jnp.float32)     # (NH, S, H)
    attn_out = jnp.sum(partial, axis=0) + bdense                      # (S, H)

    # sandwich_ln: third layernorm on attention output
    attn_out = _layer_norm(attn_out, ln3_w, ln3_b)

    ln_input = x + attn_out                                           # residual 1
    ln2_out = _layer_norm(ln_input, ln2_w, ln2_b)

    # ---- MLP ----
    h4 = _gelu(jnp.dot(ln2_out, w1_ref[...],
                       preferred_element_type=jnp.float32) + b1_ref[...])   # (S, 4H)
    mlp_out = jnp.dot(h4, w2_ref[...],
                      preferred_element_type=jnp.float32) + b2              # (S, H)

    # sandwich_ln: fourth layernorm on MLP output
    mlp_out = _layer_norm(mlp_out, ln4_w, ln4_b)

    out_ref[0] = (ln_input + mlp_out).astype(out_ref.dtype)           # residual 2

    # TODO(synk): attention/output/MLP dropout omitted — module is in eval mode.


# -------------------------------- wrapper ------------------------------------
def base_transformer_layer(hidden_states, mask, params):
    """hidden_states: (B, S, H) f32 ; mask: (1, 1, S, S) f32. Returns (out, None)."""
    (ln1_w, ln1_b, wqkv, bqkv, wdense, bdense, ln3_w, ln3_b,
     ln2_w, ln2_b, w1, b1, w2, b2, ln4_w, ln4_b) = params

    mask2d = mask.reshape(S, S)

    # Pack the 10 per-channel vectors into a single (10, H) input.
    vecs = jnp.stack([ln1_w, ln1_b, ln3_w, ln3_b, ln2_w, ln2_b,
                      ln4_w, ln4_b, bdense, b2], axis=0)

    # Per-head, (in, out)-oriented weights (relayout done once, outside kernel).
    wqkv_heads = wqkv.reshape(3, NH, HN, H).transpose(0, 1, 3, 2).reshape(3 * NH, H, HN)
    bqkv_heads = bqkv.reshape(3 * NH, 1, HN)
    wdense_heads = wdense.T.reshape(NH, HN, H)
    w1t = w1.T                                   # (H, 4H)
    b1r = b1.reshape(1, 4 * H)
    w2t = w2.T                                   # (4H, H)

    inputs = [hidden_states, mask2d, vecs, wqkv_heads, bqkv_heads,
              wdense_heads, w1t, b1r, w2t]

    def fullspec(a):
        nd = a.ndim
        return pl.BlockSpec(a.shape, lambda b, _nd=nd: (0,) * _nd)

    in_specs = [pl.BlockSpec((1, S, H), lambda b: (b, 0, 0))] + \
               [fullspec(a) for a in inputs[1:]]
    out_spec = pl.BlockSpec((1, S, H), lambda b: (b, 0, 0))

    out = pl.pallas_call(
        transformer_layer_kernel,
        grid=(B,),
        in_specs=in_specs,
        out_specs=out_spec,
        out_shape=jax.ShapeDtypeStruct((B, S, H), jnp.float32),
        compiler_params=pltpu.CompilerParams(dimension_semantics=("parallel",)),
    )(*inputs)
    return out, None


# --------------------------- pure-JAX reference ------------------------------
def reference(hidden_states, mask, params):
    (ln1_w, ln1_b, wqkv, bqkv, wdense, bdense, ln3_w, ln3_b,
     ln2_w, ln2_b, w1, b1, w2, b2, ln4_w, ln4_b) = params

    def ln(v, w, b):
        mu = jnp.mean(v, -1, keepdims=True)
        var = jnp.mean((v - mu) ** 2, -1, keepdims=True)
        return (v - mu) / jnp.sqrt(var + EPS) * w + b

    def gelu(v):
        return 0.5 * v * (1.0 + jnp.tanh(0.7978845608028654 * v * (1.0 + 0.044715 * v * v)))

    x = hidden_states
    ln1_out = ln(x, ln1_w, ln1_b)
    qkv = ln1_out @ wqkv.T + bqkv
    q, k, v = jnp.split(qkv, 3, axis=-1)
    tr = lambda t: t.reshape(B, S, NH, HN).transpose(0, 2, 1, 3)
    q, k, v = tr(q), tr(k), tr(v)
    scores = jnp.einsum("bnqd,bnkd->bnqk", q / math.sqrt(HN), k)
    scores = scores * mask - 10000.0 * (1.0 - mask)
    probs = jax.nn.softmax(scores, axis=-1)
    ctx = jnp.einsum("bnqk,bnkd->bnqd", probs, v)
    ctx = ctx.transpose(0, 2, 1, 3).reshape(B, S, H)
    attn_out = ctx @ wdense.T + bdense
    attn_out = ln(attn_out, ln3_w, ln3_b)
    ln_input = x + attn_out
    ln2_out = ln(ln_input, ln2_w, ln2_b)
    mlp_out = gelu(ln2_out @ w1.T + b1) @ w2.T + b2
    mlp_out = ln(mlp_out, ln4_w, ln4_b)
    return ln_input + mlp_out


# ----------------------------------- main -------------------------------------
if __name__ == "__main__":
    key = jax.random.PRNGKey(0)
    ks = jax.random.split(key, 24)
    init = lambda k, shape, scale=0.02: (scale * jax.random.normal(k, shape)).astype(jnp.float32)

    params = (
        1.0 + init(ks[0], (H,), 0.1), init(ks[1], (H,), 0.1),         # input LN
        init(ks[2], (3 * H, H)), init(ks[3], (3 * H,)),               # query_key_value
        init(ks[4], (H, H)), init(ks[5], (H,)),                       # attention dense
        1.0 + init(ks[6], (H,), 0.1), init(ks[7], (H,), 0.1),         # third LN (sandwich)
        1.0 + init(ks[8], (H,), 0.1), init(ks[9], (H,), 0.1),         # post-attention LN
        init(ks[10], (4 * H, H)), init(ks[11], (4 * H,)),             # dense_h_to_4h
        init(ks[12], (H, 4 * H)), init(ks[13], (H,)),                 # dense_4h_to_h
        1.0 + init(ks[14], (H,), 0.1), init(ks[15], (H,), 0.1),       # fourth LN (sandwich)
    )

    hidden_states = init(ks[16], (B, S, H), 1.0)
    # lower-triangular (causal) attention mask, float, shape (1, 1, S, S)
    mask = jnp.tril(jnp.ones((S, S), jnp.float32)).reshape(1, 1, S, S)

    out, _ = base_transformer_layer(hidden_states, mask, params)
    out = jax.block_until_ready(out)

    ref = reference(hidden_states, mask, params)
    np.testing.assert_allclose(np.asarray(out), np.asarray(ref), rtol=1e-4, atol=1e-4)

    print("KERNEL_OK")
</pallas_src>

<mosaic_0001>
module attributes {stable_mosaic.version = 11 : i64} {
  func.func @transformer_layer_kernel(%arg0: i32, %arg1: memref<1x8x32xf32, #tpu.memory_space<vmem>>, %arg2: memref<8x8xf32, #tpu.memory_space<vmem>>, %arg3: memref<10x32xf32, #tpu.memory_space<vmem>>, %arg4: memref<12x32x8xf32, #tpu.memory_space<vmem>>, %arg5: memref<12x1x8xf32, #tpu.memory_space<vmem>>, %arg6: memref<4x8x32xf32, #tpu.memory_space<vmem>>, %arg7: memref<32x128xf32, #tpu.memory_space<vmem>>, %arg8: memref<1x128xf32, #tpu.memory_space<vmem>>, %arg9: memref<128x32xf32, #tpu.memory_space<vmem>>, %arg10: memref<1x8x32xf32, #tpu.memory_space<vmem>>) attributes {dimension_semantics = [#tpu.dimension_semantics<parallel>], iteration_bounds = array<i64: 2>, scalar_prefetch = 0 : i64, scratch_operands = 0 : i64, tpu.core_type = #tpu.core_type<tc>, window_params = [{transform_indices = @transform_0, window_bounds = array<i64: 1, 8, 32>}, {pipeline_mode = #tpu.pipeline_mode<synchronous>, transform_indices = @transform_1, window_bounds = array<i64: 8, 8>}, {pipeline_mode = #tpu.pipeline_mode<synchronous>, transform_indices = @transform_2, window_bounds = array<i64: 10, 32>}, {pipeline_mode = #tpu.pipeline_mode<synchronous>, transform_indices = @transform_3, window_bounds = array<i64: 12, 32, 8>}, {pipeline_mode = #tpu.pipeline_mode<synchronous>, transform_indices = @transform_4, window_bounds = array<i64: 12, 1, 8>}, {pipeline_mode = #tpu.pipeline_mode<synchronous>, transform_indices = @transform_5, window_bounds = array<i64: 4, 8, 32>}, {pipeline_mode = #tpu.pipeline_mode<synchronous>, transform_indices = @transform_6, window_bounds = array<i64: 32, 128>}, {pipeline_mode = #tpu.pipeline_mode<synchronous>, transform_indices = @transform_7, window_bounds = array<i64: 1, 128>}, {pipeline_mode = #tpu.pipeline_mode<synchronous>, transform_indices = @transform_8, window_bounds = array<i64: 128, 32>}, {transform_indices = @transform_9, window_bounds = array<i64: 1, 8, 32>}]} {
    %c0 = arith.constant 0 : index
    %c0_0 = arith.constant 0 : index
    %c0_1 = arith.constant 0 : index
    %0 = vector.load %arg1[%c0, %c0_0, %c0_1] : memref<1x8x32xf32, #tpu.memory_space<vmem>>, vector<1x8x32xf32>
    %1 = vector.shape_cast %0 : vector<1x8x32xf32> to vector<8x32xf32>
    %c0_2 = arith.constant 0 : index
    %c0_3 = arith.constant 0 : index
    %2 = vector.load %arg2[%c0_2, %c0_3] : memref<8x8xf32, #tpu.memory_space<vmem>>, vector<8x8xf32>
    %c0_4 = arith.constant 0 : index
    %c0_5 = arith.constant 0 : index
    %3 = vector.load %arg3[%c0_4, %c0_5] : memref<10x32xf32, #tpu.memory_space<vmem>>, vector<10x32xf32>
    %4 = vector.extract_strided_slice %3 {offsets = [0, 0], sizes = [1, 32], strides = [1, 1]} : vector<10x32xf32> to vector<1x32xf32>
    %5 = vector.extract_strided_slice %3 {offsets = [1, 0], sizes = [1, 32], strides = [1, 1]} : vector<10x32xf32> to vector<1x32xf32>
    %6 = vector.extract_strided_slice %3 {offsets = [2, 0], sizes = [1, 32], strides = [1, 1]} : vector<10x32xf32> to vector<1x32xf32>
    %7 = vector.extract_strided_slice %3 {offsets = [3, 0], sizes = [1, 32], strides = [1, 1]} : vector<10x32xf32> to vector<1x32xf32>
    %8 = vector.extract_strided_slice %3 {offsets = [4, 0], sizes = [1, 32], strides = [1, 1]} : vector<10x32xf32> to vector<1x32xf32>
    %9 = vector.extract_strided_slice %3 {offsets = [5, 0], sizes = [1, 32], strides = [1, 1]} : vector<10x32xf32> to vector<1x32xf32>
    %10 = vector.extract_strided_slice %3 {offsets = [6, 0], sizes = [1, 32], strides = [1, 1]} : vector<10x32xf32> to vector<1x32xf32>
    %11 = vector.extract_strided_slice %3 {offsets = [7, 0], sizes = [1, 32], strides = [1, 1]} : vector<10x32xf32> to vector<1x32xf32>
    %12 = vector.extract_strided_slice %3 {offsets = [8, 0], sizes = [1, 32], strides = [1, 1]} : vector<10x32xf32> to vector<1x32xf32>
    %13 = vector.extract_strided_slice %3 {offsets = [9, 0], sizes = [1, 32], strides = [1, 1]} : vector<10x32xf32> to vector<1x32xf32>
    %cst = arith.constant dense<0.000000e+00> : vector<8xf32>
    %14 = vector.multi_reduction <add>, %1, %cst [1] : vector<8x32xf32> to vector<8xf32>
    %15 = vector.shape_cast %14 : vector<8xf32> to vector<8x1xf32>
    %cst_6 = arith.constant 3.125000e-02 : f32
    %16 = vector.broadcast %cst_6 : f32 to vector<8x1xf32>
    %17 = arith.mulf %15, %16 : vector<8x1xf32>
    %18 = vector.broadcast %17 : vector<8x1xf32> to vector<8x32xf32>
    %19 = arith.subf %1, %18 : vector<8x32xf32>
    %20 = arith.mulf %19, %19 : vector<8x32xf32>
    %cst_7 = arith.constant dense<0.000000e+00> : vector<8xf32>
    %21 = vector.multi_reduction <add>, %20, %cst_7 [1] : vector<8x32xf32> to vector<8xf32>
    %22 = vector.shape_cast %21 : vector<8xf32> to vector<8x1xf32>
    %cst_8 = arith.constant 3.125000e-02 : f32
    %23 = vector.broadcast %cst_8 : f32 to vector<8x1xf32>
    %24 = arith.mulf %22, %23 : vector<8x1xf32>
    %cst_9 = arith.constant 9.99999974E-6 : f32
    %25 = vector.broadcast %cst_9 : f32 to vector<8x1xf32>
    %26 = arith.addf %24, %25 : vector<8x1xf32>
    %27 = math.rsqrt %26 : vector<8x1xf32>
    %28 = vector.broadcast %27 : vector<8x1xf32> to vector<8x32xf32>
    %29 = arith.mulf %19, %28 : vector<8x32xf32>
    %30 = vector.broadcast %4 : vector<1x32xf32> to vector<8x32xf32>
    %31 = arith.mulf %29, %30 : vector<8x32xf32>
    %32 = vector.broadcast %5 : vector<1x32xf32> to vector<8x32xf32>
    %33 = arith.addf %31, %32 : vector<8x32xf32>
    %34 = vector.shape_cast %33 : vector<8x32xf32> to vector<1x8x32xf32>
    %35 = vector.broadcast %34 : vector<1x8x32xf32> to vector<12x8x32xf32>
    %c0_10 = arith.constant 0 : index
    %c0_11 = arith.constant 0 : index
    %c0_12 = arith.constant 0 : index
    %36 = vector.load %arg4[%c0_10, %c0_11, %c0_12] : memref<12x32x8xf32, #tpu.memory_space<vmem>>, vector<12x32x8xf32>
    %cst_13 = arith.constant dense<0.000000e+00> : vector<12x8x8xf32>
    %37 = tpu.matmul %35, %36, %cst_13 {dimension_numbers = #tpu.dot_dimension_numbers<[2], [1], [1], [2], [0, 0, 0, 1, 1, 2], [0], [0]>} : vector<12x8x32xf32>, vector<12x32x8xf32>, vector<12x8x8xf32> -> vector<12x8x8xf32>
    %c0_14 = arith.constant 0 : index
    %c0_15 = arith.constant 0 : index
    %c0_16 = arith.constant 0 : index
    %38 = vector.load %arg5[%c0_14, %c0_15, %c0_16] : memref<12x1x8xf32, #tpu.memory_space<vmem>>, vector<12x1x8xf32>
    %39 = vector.broadcast %38 : vector<12x1x8xf32> to vector<12x8x8xf32>
    %40 = arith.addf %37, %39 : vector<12x8x8xf32>
    %41 = vector.extract_strided_slice %40 {offsets = [0, 0, 0], sizes = [4, 8, 8], strides = [1, 1, 1]} : vector<12x8x8xf32> to vector<4x8x8xf32>
    %cst_17 = arith.constant 0.353553385 : f32
    %42 = vector.broadcast %cst_17 : f32 to vector<4x8x8xf32>
    %43 = arith.mulf %41, %42 : vector<4x8x8xf32>
    %44 = vector.extract_strided_slice %40 {offsets = [4, 0, 0], sizes = [4, 8, 8], strides = [1, 1, 1]} : vector<12x8x8xf32> to vector<4x8x8xf32>
    %45 = vector.extract_strided_slice %40 {offsets = [8, 0, 0], sizes = [4, 8, 8], strides = [1, 1, 1]} : vector<12x8x8xf32> to vector<4x8x8xf32>
    %cst_18 = arith.constant dense<0.000000e+00> : vector<4x8x8xf32>
    %46 = tpu.matmul %43, %44, %cst_18 {dimension_numbers = #tpu.dot_dimension_numbers<[2], [2], [1], [1], [0, 0, 0, 1, 1, 1], [0], [0]>} : vector<4x8x8xf32>, vector<4x8x8xf32>, vector<4x8x8xf32> -> vector<4x8x8xf32>
    %cst_19 = arith.constant 1.000000e+00 : f32
    %47 = vector.broadcast %cst_19 : f32 to vector<8x8xf32>
    %48 = arith.subf %47, %2 : vector<8x8xf32>
    %cst_20 = arith.constant -1.000000e+04 : f32
    %49 = vector.broadcast %cst_20 : f32 to vector<8x8xf32>
    %50 = arith.mulf %49, %48 : vector<8x8xf32>
    %51 = vector.shape_cast %2 : vector<8x8xf32> to vector<1x8x8xf32>
    %52 = vector.broadcast %51 : vector<1x8x8xf32> to vector<4x8x8xf32>
    %53 = arith.mulf %46, %52 : vector<4x8x8xf32>
    %54 = vector.shape_cast %50 : vector<8x8xf32> to vector<1x8x8xf32>
    %55 = vector.broadcast %54 : vector<1x8x8xf32> to vector<4x8x8xf32>
    %56 = arith.addf %53, %55 : vector<4x8x8xf32>
    %cst_21 = arith.constant dense<0xFF800000> : vector<4x8xf32>
    %57 = vector.multi_reduction <maximumf>, %56, %cst_21 [2] : vector<4x8x8xf32> to vector<4x8xf32>
    %58 = vector.shape_cast %57 : vector<4x8xf32> to vector<4x8x1xf32>
    %59 = vector.broadcast %58 : vector<4x8x1xf32> to vector<4x8x8xf32>
    %60 = arith.subf %56, %59 : vector<4x8x8xf32>
    %61 = math.exp %60 : vector<4x8x8xf32>
    %cst_22 = arith.constant dense<0.000000e+00> : vector<4x8xf32>
    %62 = vector.multi_reduction <add>, %61, %cst_22 [2] : vector<4x8x8xf32> to vector<4x8xf32>
    %63 = vector.shape_cast %62 : vector<4x8xf32> to vector<4x8x1xf32>
    %64 = tpu.reciprocal %63 : vector<4x8x1xf32> -> vector<4x8x1xf32>
    %65 = vector.broadcast %64 : vector<4x8x1xf32> to vector<4x8x8xf32>
    %66 = arith.mulf %61, %65 : vector<4x8x8xf32>
    %cst_23 = arith.constant dense<0.000000e+00> : vector<4x8x8xf32>
    %67 = tpu.matmul %66, %45, %cst_23 {dimension_numbers = #tpu.dot_dimension_numbers<[2], [1], [1], [2], [0, 0, 0, 1, 1, 2], [0], [0]>} : vector<4x8x8xf32>, vector<4x8x8xf32>, vector<4x8x8xf32> -> vector<4x8x8xf32>
    %c0_24 = arith.constant 0 : index
    %c0_25 = arith.constant 0 : index
    %c0_26 = arith.constant 0 : index
    %68 = vector.load %arg6[%c0_24, %c0_25, %c0_26] : memref<4x8x32xf32, #tpu.memory_space<vmem>>, vector<4x8x32xf32>
    %cst_27 = arith.constant dense<0.000000e+00> : vector<4x8x32xf32>
    %69 = tpu.matmul %67, %68, %cst_27 {dimension_numbers = #tpu.dot_dimension_numbers<[2], [1], [1], [2], [0, 0, 0, 1, 1, 2], [0], [0]>} : vector<4x8x8xf32>, vector<4x8x32xf32>, vector<4x8x32xf32> -> vector<4x8x32xf32>
    %cst_28 = arith.constant dense<0.000000e+00> : vector<8x32xf32>
    %70 = vector.multi_reduction <add>, %69, %cst_28 [0] : vector<4x8x32xf32> to vector<8x32xf32>
    %71 = vector.broadcast %12 : vector<1x32xf32> to vector<8x32xf32>
    %72 = arith.addf %70, %71 : vector<8x32xf32>
    %cst_29 = arith.constant dense<0.000000e+00> : vector<8xf32>
    %73 = vector.multi_reduction <add>, %72, %cst_29 [1] : vector<8x32xf32> to vector<8xf32>
    %74 = vector.shape_cast %73 : vector<8xf32> to vector<8x1xf32>
    %cst_30 = arith.constant 3.125000e-02 : f32
    %75 = vector.broadcast %cst_30 : f32 to vector<8x1xf32>
    %76 = arith.mulf %74, %75 : vector<8x1xf32>
    %77 = vector.broadcast %76 : vector<8x1xf32> to vector<8x32xf32>
    %78 = arith.subf %72, %77 : vector<8x32xf32>
    %79 = arith.mulf %78, %78 : vector<8x32xf32>
    %cst_31 = arith.constant dense<0.000000e+00> : vector<8xf32>
    %80 = vector.multi_reduction <add>, %79, %cst_31 [1] : vector<8x32xf32> to vector<8xf32>
    %81 = vector.shape_cast %80 : vector<8xf32> to vector<8x1xf32>
    %cst_32 = arith.constant 3.125000e-02 : f32
    %82 = vector.broadcast %cst_32 : f32 to vector<8x1xf32>
    %83 = arith.mulf %81, %82 : vector<8x1xf32>
    %cst_33 = arith.constant 9.99999974E-6 : f32
    %84 = vector.broadcast %cst_33 : f32 to vector<8x1xf32>
    %85 = arith.addf %83, %84 : vector<8x1xf32>
    %86 = math.rsqrt %85 : vector<8x1xf32>
    %87 = vector.broadcast %86 : vector<8x1xf32> to vector<8x32xf32>
    %88 = arith.mulf %78, %87 : vector<8x32xf32>
    %89 = vector.broadcast %6 : vector<1x32xf32> to vector<8x32xf32>
    %90 = arith.mulf %88, %89 : vector<8x32xf32>
    %91 = vector.broadcast %7 : vector<1x32xf32> to vector<8x32xf32>
    %92 = arith.addf %90, %91 : vector<8x32xf32>
    %93 = arith.addf %1, %92 : vector<8x32xf32>
    %cst_34 = arith.constant dense<0.000000e+00> : vector<8xf32>
    %94 = vector.multi_reduction <add>, %93, %cst_34 [1] : vector<8x32xf32> to vector<8xf32>
    %95 = vector.shape_cast %94 : vector<8xf32> to vector<8x1xf32>
    %cst_35 = arith.constant 3.125000e-02 : f32
    %96 = vector.broadcast %cst_35 : f32 to vector<8x1xf32>
    %97 = arith.mulf %95, %96 : vector<8x1xf32>
    %98 = vector.broadcast %97 : vector<8x1xf32> to vector<8x32xf32>
    %99 = arith.subf %93, %98 : vector<8x32xf32>
    %100 = arith.mulf %99, %99 : vector<8x32xf32>
    %cst_36 = arith.constant dense<0.000000e+00> : vector<8xf32>
    %101 = vector.multi_reduction <add>, %100, %cst_36 [1] : vector<8x32xf32> to vector<8xf32>
    %102 = vector.shape_cast %101 : vector<8xf32> to vector<8x1xf32>
    %cst_37 = arith.constant 3.125000e-02 : f32
    %103 = vector.broadcast %cst_37 : f32 to vector<8x1xf32>
    %104 = arith.mulf %102, %103 : vector<8x1xf32>
    %cst_38 = arith.constant 9.99999974E-6 : f32
    %105 = vector.broadcast %cst_38 : f32 to vector<8x1xf32>
    %106 = arith.addf %104, %105 : vector<8x1xf32>
    %107 = math.rsqrt %106 : vector<8x1xf32>
    %108 = vector.broadcast %107 : vector<8x1xf32> to vector<8x32xf32>
    %109 = arith.mulf %99, %108 : vector<8x32xf32>
    %110 = vector.broadcast %8 : vector<1x32xf32> to vector<8x32xf32>
    %111 = arith.mulf %109, %110 : vector<8x32xf32>
    %112 = vector.broadcast %9 : vector<1x32xf32> to vector<8x32xf32>
    %113 = arith.addf %111, %112 : vector<8x32xf32>
    %c0_39 = arith.constant 0 : index
    %c0_40 = arith.constant 0 : index
    %114 = vector.load %arg7[%c0_39, %c0_40] : memref<32x128xf32, #tpu.memory_space<vmem>>, vector<32x128xf32>
    %cst_41 = arith.constant dense<0.000000e+00> : vector<8x128xf32>
    %115 = tpu.matmul %113, %114, %cst_41 {dimension_numbers = #tpu.dot_dimension_numbers<[1], [0], [0], [1], [0, 0, 1, 1], [], []>} : vector<8x32xf32>, vector<32x128xf32>, vector<8x128xf32> -> vector<8x128xf32>
    %c0_42 = arith.constant 0 : index
    %c0_43 = arith.constant 0 : index
    %116 = vector.load %arg8[%c0_42, %c0_43] : memref<1x128xf32, #tpu.memory_space<vmem>>, vector<1x128xf32>
    %117 = vector.broadcast %116 : vector<1x128xf32> to vector<8x128xf32>
    %118 = arith.addf %115, %117 : vector<8x128xf32>
    %cst_44 = arith.constant 5.000000e-01 : f32
    %119 = vector.broadcast %cst_44 : f32 to vector<8x128xf32>
    %120 = arith.mulf %119, %118 : vector<8x128xf32>
    %cst_45 = arith.constant 0.797884583 : f32
    %121 = vector.broadcast %cst_45 : f32 to vector<8x128xf32>
    %122 = arith.mulf %121, %118 : vector<8x128xf32>
    %cst_46 = arith.constant 4.471500e-02 : f32
    %123 = vector.broadcast %cst_46 : f32 to vector<8x128xf32>
    %124 = arith.mulf %123, %118 : vector<8x128xf32>
    %125 = arith.mulf %124, %118 : vector<8x128xf32>
    %cst_47 = arith.constant 1.000000e+00 : f32
    %126 = vector.broadcast %cst_47 : f32 to vector<8x128xf32>
    %127 = arith.addf %126, %125 : vector<8x128xf32>
    %128 = arith.mulf %122, %127 : vector<8x128xf32>
    %129 = math.tanh %128 : vector<8x128xf32>
    %cst_48 = arith.constant 1.000000e+00 : f32
    %130 = vector.broadcast %cst_48 : f32 to vector<8x128xf32>
    %131 = arith.addf %130, %129 : vector<8x128xf32>
    %132 = arith.mulf %120, %131 : vector<8x128xf32>
    %c0_49 = arith.constant 0 : index
    %c0_50 = arith.constant 0 : index
    %133 = vector.load %arg9[%c0_49, %c0_50] : memref<128x32xf32, #tpu.memory_space<vmem>>, vector<128x32xf32>
    %cst_51 = arith.constant dense<0.000000e+00> : vector<8x32xf32>
    %134 = tpu.matmul %132, %133, %cst_51 {dimension_numbers = #tpu.dot_dimension_numbers<[1], [0], [0], [1], [0, 0, 1, 1], [], []>} : vector<8x128xf32>, vector<128x32xf32>, vector<8x32xf32> -> vector<8x32xf32>
    %135 = vector.broadcast %13 : vector<1x32xf32> to vector<8x32xf32>
    %136 = arith.addf %134, %135 : vector<8x32xf32>
    %cst_52 = arith.constant dense<0.000000e+00> : vector<8xf32>
    %137 = vector.multi_reduction <add>, %136, %cst_52 [1] : vector<8x32xf32> to vector<8xf32>
    %138 = vector.shape_cast %137 : vector<8xf32> to vector<8x1xf32>
    %cst_53 = arith.constant 3.125000e-02 : f32
    %139 = vector.broadcast %cst_53 : f32 to vector<8x1xf32>
    %140 = arith.mulf %138, %139 : vector<8x1xf32>
    %141 = vector.broadcast %140 : vector<8x1xf32> to vector<8x32xf32>
    %142 = arith.subf %136, %141 : vector<8x32xf32>
    %143 = arith.mulf %142, %142 : vector<8x32xf32>
    %cst_54 = arith.constant dense<0.000000e+00> : vector<8xf32>
    %144 = vector.multi_reduction <add>, %143, %cst_54 [1] : vector<8x32xf32> to vector<8xf32>
    %145 = vector.shape_cast %144 : vector<8xf32> to vector<8x1xf32>
    %cst_55 = arith.constant 3.125000e-02 : f32
    %146 = vector.broadcast %cst_55 : f32 to vector<8x1xf32>
    %147 = arith.mulf %145, %146 : vector<8x1xf32>
    %cst_56 = arith.constant 9.99999974E-6 : f32
    %148 = vector.broadcast %cst_56 : f32 to vector<8x1xf32>
    %149 = arith.addf %147, %148 : vector<8x1xf32>
    %150 = math.rsqrt %149 : vector<8x1xf32>
    %151 = vector.broadcast %150 : vector<8x1xf32> to vector<8x32xf32>
    %152 = arith.mulf %142, %151 : vector<8x32xf32>
    %153 = vector.broadcast %10 : vector<1x32xf32> to vector<8x32xf32>
    %154 = arith.mulf %152, %153 : vector<8x32xf32>
    %155 = vector.broadcast %11 : vector<1x32xf32> to vector<8x32xf32>
    %156 = arith.addf %154, %155 : vector<8x32xf32>
    %157 = arith.addf %93, %156 : vector<8x32xf32>
    %c0_57 = arith.constant 0 : index
    %c0_58 = arith.constant 0 : index
    %c0_59 = arith.constant 0 : index
    %158 = vector.load %arg10[%c0_57, %c0_58, %c0_59] : memref<1x8x32xf32, #tpu.memory_space<vmem>>, vector<1x8x32xf32>
    %159 = vector.shape_cast %158 : vector<1x8x32xf32> to vector<8x32xf32>
    %160 = vector.shape_cast %157 : vector<8x32xf32> to vector<1x8x32xf32>
    tpu.vector_store %arg10[%c0_57, %c0_58, %c0_59], %160 {strides = array<i32>} : memref<1x8x32xf32, #tpu.memory_space<vmem>>, vector<1x8x32xf32>,
    return
  }
  func.func @transform_0(%arg0: i32) -> (i32, i32, i32) {
    %c0_i32 = arith.constant 0 : i32
    %c0_i32_0 = arith.constant 0 : i32
    %c0_i32_1 = arith.constant 0 : i32
    return %arg0, %c0_i32, %c0_i32_0 : i32, i32, i32
  }
  func.func @transform_1(%arg0: i32) -> (i32, i32) {
    %c0_i32 = arith.constant 0 : i32
    %c0_i32_0 = arith.constant 0 : i32
    %c0_i32_1 = arith.constant 0 : i32
    return %c0_i32, %c0_i32_0 : i32, i32
  }
  func.func @transform_2(%arg0: i32) -> (i32, i32) {
    %c0_i32 = arith.constant 0 : i32
    %c0_i32_0 = arith.constant 0 : i32
    %c0_i32_1 = arith.constant 0 : i32
    return %c0_i32, %c0_i32_0 : i32, i32
  }
  func.func @transform_3(%arg0: i32) -> (i32, i32, i32) {
    %c0_i32 = arith.constant 0 : i32
    %c0_i32_0 = arith.constant 0 : i32
    %c0_i32_1 = arith.constant 0 : i32
    %c0_i32_2 = arith.constant 0 : i32
    return %c0_i32, %c0_i32_0, %c0_i32_1 : i32, i32, i32
  }
  func.func @transform_4(%arg0: i32) -> (i32, i32, i32) {
    %c0_i32 = arith.constant 0 : i32
    %c0_i32_0 = arith.constant 0 : i32
    %c0_i32_1 = arith.constant 0 : i32
    %c0_i32_2 = arith.constant 0 : i32
    return %c0_i32, %c0_i32_0, %c0_i32_1 : i32, i32, i32
  }
  func.func @transform_5(%arg0: i32) -> (i32, i32, i32) {
    %c0_i32 = arith.constant 0 : i32
    %c0_i32_0 = arith.constant 0 : i32
    %c0_i32_1 = arith.constant 0 : i32
    %c0_i32_2 = arith.constant 0 : i32
    return %c0_i32, %c0_i32_0, %c0_i32_1 : i32, i32, i32
  }
  func.func @transform_6(%arg0: i32) -> (i32, i32) {
    %c0_i32 = arith.constant 0 : i32
    %c0_i32_0 = arith.constant 0 : i32
    %c0_i32_1 = arith.constant 0 : i32
    return %c0_i32, %c0_i32_0 : i32, i32
  }
  func.func @transform_7(%arg0: i32) -> (i32, i32) {
    %c0_i32 = arith.constant 0 : i32
    %c0_i32_0 = arith.constant 0 : i32
    %c0_i32_1 = arith.constant 0 : i32
    return %c0_i32, %c0_i32_0 : i32, i32
  }
  func.func @transform_8(%arg0: i32) -> (i32, i32) {
    %c0_i32 = arith.constant 0 : i32
    %c0_i32_0 = arith.constant 0 : i32
    %c0_i32_1 = arith.constant 0 : i32
    return %c0_i32, %c0_i32_0 : i32, i32
  }
  func.func @transform_9(%arg0: i32) -> (i32, i32, i32) {
    %c0_i32 = arith.constant 0 : i32
    %c0_i32_0 = arith.constant 0 : i32
    %c0_i32_1 = arith.constant 0 : i32
    return %arg0, %c0_i32, %c0_i32_0 : i32, i32, i32
  }
}

</mosaic_0001>

<bundles_post_ra>
// kernel: tpu_custom_call.1
= control target key start
LH: loop header
LB: loop body
LE: loop exit
PB: predicated region body
PF: predicated region fallthrough
CT: control target
= control target key end

     0   :  { %14 = vsyncpa [#allocation3], 0  ;;  %s3795_s0 = inlined_call_operand.vmem [shape: f32[2,8,32], index: 0, kind: input, shape index: {}]   ;;  %s3796_s1 = inlined_call_operand.vmem [shape: f32[8,8], index: 1, kind: input, shape index: {}]   ;;  %s3797_s2 = inlined_call_operand.vmem [shape: f32[10,32], index: 2, kind: input, shape index: {}]   ;;  %s3798_s3 = inlined_call_operand.vmem [shape: f32[12,32,8], index: 3, kind: input, shape index: {}]   ;;  %s3799_s4 = inlined_call_operand.vmem [shape: f32[12,1,8], index: 4, kind: input, shape index: {}]   ;;  %s3800_s5 = inlined_call_operand.vmem [shape: f32[4,8,32], index: 5, kind: input, shape index: {}]   ;;  %s3801_s6 = inlined_call_operand.vmem [shape: f32[32,128], index: 6, kind: input, shape index: {}]   ;;  %s3802_s7 = inlined_call_operand.vmem [shape: f32[1,128], index: 7, kind: input, shape index: {}]   ;;  %s3803_s8 = inlined_call_operand.vmem [shape: f32[128,32], index: 8, kind: input, shape index: {}]   ;;  %s3804_s9 = inlined_call_operand.hbm [shape: f32[2,8,32], index: 9, kind: output, shape index: {}]  }
   0x1   :  { %16 = vsyncpa [#allocation3 + $0x1], 0  ;;  %s3200_s30 = smov 0   ;;  %s3202_s10 = smov 0  }
   0x2   :  { %s3204_s11 = smov 0   ;;  %s3206_s12 = smov 0  }
   0x3 LB: > { %s3221_s13 = sadd.s32 4294967295, %s3145_s12   ;;  %s2622_s14 = sadd.s32 4294967294, %s3145_s12   ;;  %s3145_s12 = sphi %s3206_s12, %s3810_s12   ;;  %s3141_s11 = sphi %s3204_s11, %s3809_s11   ;;  %s3137_s10 = sphi %s3202_s10, %s3808_s10   ;;  %s3133_s30 = sphi %s3200_s30, %s3807_s30  }
   0x4   : > { %s3225_s15 = sadd.s32 1, %s3145_s12   ;;  %s223_s16 = sadd.s32 1, %s3141_s11 }
   0x5   : > { %s220_s17 = ssub.s32 %s3145_s12, %s3225_s15  ;;  %p233_p0 = scmp.ne.s32.totalorder %s3141_s11, %s3137_s10 }
   0x6   : > { %p221_p1 = scmp.eq.s32.totalorder %s220_s17, 0  ;;  %p234_p2 = scmp.eq.s32.totalorder %s3221_s13, 1 }
   0x7   : > { %p239_p3 = scmp.ne.s32.totalorder %s3137_s10, %s3133_s30  ;;  %p240_p4 = scmp.eq.s32.totalorder %s2622_s14, 1 }
   0x8   : > { %s3236_s18 = scalar_select %p221_p1, %s3141_s11, %s223_s16  }
   0x9   : > { %p3238_p5 = por %p234_p2, %p233_p0  ;;  %p3242_p6 = por %p240_p4, %p239_p3 }
   0xa   : > { %p2625_p7 = scmp.ge.s32.totalorder %s3145_s12, 1  ;;  %p289_p8 = scmp.lt.s32.totalorder %s3145_s12, 3 }
   0xc   : > { %p290_p9 = pnand %p2625_p7, %p289_p8 }
   0xd   : > { %p324_p10 = scmp.lt.s32.totalorder (!%p290_p9), %s3221_s13, 1  ;;  %s2671_s24 = sshll.u32 (!%p290_p9), %s3221_s13, 7 }
   0xe   : > { %293 = sbr.rel (%p290_p9) target bundleno = 2828 (0xb0c), region = 56  ;;  %s2561_s29 = scalar_lea.hbm (!%p290_p9), %s3804_s9, %s2671_s24 }
   0xf   : > { %s3149_s17 = smov (!%p290_p9), [#allocation2]  }
  0x13   : > { %s325_s21 = scalar_select %p324_p10, %s3221_s13, 1  ;;  %vm332_vm0 = vcmask 261120   ;;  %v3147_v7 = vmov 0.0   ;;  %v359_v8 = vld [vmem:[%s3798_s3 + $0x18] sm:$0xff]  ;;  %v358_v10 = vld [vmem:[%s3798_s3 + $0x10] sm:$0xff]  ;;  %v357_v12 = vld [vmem:[%s3798_s3 + $0x8] sm:$0xff]  ;;  %v346_v19 = vlaneseq }
  0x14   : > { %2780 = vmatprep.subr.mxu0 %v3147_v7  ;;  %2813 = vmatprep.subr.mxu1 %v3147_v7  ;;  %v371_v9 = vld [vmem:[%s3798_s3 + $0x78] sm:$0xff]  ;;  %v370_v11 = vld [vmem:[%s3798_s3 + $0x70] sm:$0xff]  ;;  %v369_v13 = vld [vmem:[%s3798_s3 + $0x68] sm:$0xff]  ;;  %vm3148_vm1 = vmmov 0   ;;  %vm1335_vm2 = vcmask 64512   ;;  %s3089_s13 = sshll.u32 %s3149_s17, 4  ;;  %s3090_s13 = int_to_ptr.vmem [resolvable:$false] %s3089_s13 }
  0x15   : > { %s2627_s22 = sshll.u32 %s325_s21, 3  ;;  %2781 = vmatpush3.msra.mxu0 %v359_v8  ;;  %2814 = vmatpush3.msra.mxu1 %v371_v9  ;;  %v356_v14 = vld [vmem:[%s3798_s3] sm:$0xff]  ;;  %v3297_v20 = vshrl.u32 %v346_v19, 7  ;;  %v363_v30 = vld [vmem:[%s3798_s3 + $0x38] sm:$0xff]  ;;  %v362_v32 = vld [vmem:[%s3798_s3 + $0x30] sm:$0xff]  ;;  %s3091_s21 = scalar_lea.vmem %s3090_s13, 256 }
  0x16   : > { %s327_s25 = scalar_lea.vmem %s3795_s0, %s2627_s22  ;;  %2782 = vmatprep.subr.mxu0 %v3147_v7  ;;  %2815 = vmatprep.subr.mxu1 %v3147_v7  ;;  %v368_v15 = vld [vmem:[%s3798_s3 + $0x60] sm:$0xff]  ;;  %v379_v31 = vld [vmem:[%s3798_s3 + $0xb8] sm:$0xff]  ;;  %v378_v33 = vld [vmem:[%s3798_s3 + $0xb0] sm:$0xff]  ;;  %s321_s22 = sand.u32 1, %s3137_s10  }
  0x17   : > { %v3253_v0 = vld [vmem:[%s327_s25] sm:$0xff]  ;;  %2783 = vmatpush3.msra.mxu0 %v358_v10  ;;  %2816 = vmatpush3.msra.mxu1 %v370_v11  ;;  %v348_v21 = vsub.s32 0, %v3297_v20  ;;  %v353_v23 = vsub.s32 1, %v3297_v20  ;;  %v361_v34 = vld [vmem:[%s3798_s3 + $0x28] sm:$0xff]  ;;  %v367_v38 = vld [vmem:[%s3798_s3 + $0x58] sm:$0xff]  ;;  %s2626_s23 = sshll.u32 %s321_s22, 3 }
  0x18   : > { %v333_v1 = vsel %vm332_vm0, %v3253_v0, 0.0  ;;  %2784 = vmatprep.subr.mxu0 %v3147_v7  ;;  %2817 = vmatprep.subr.mxu1 %v3147_v7  ;;  %v3303_v22 = vld [vmem:[%s3797_s2] sm:$0xff]  ;;  %v377_v35 = vld [vmem:[%s3798_s3 + $0xa8] sm:$0xff]  ;;  %v387_v39 = vld [vmem:[%s3798_s3 + $0xf8] sm:$0xff]  ;;  %s323_s25 = scalar_lea.vmem [#allocation2], %s2626_s23  ;;  %s2550_s14 = scalar_lea.sflag [#allocation3], %s321_s22 }
  0x19   : > { %334 = vadd.xlane.f32.xlu0 %v333_v1  ;;  %2785 = vmatpush3.msra.mxu0 %v357_v12  ;;  %v349_v24 = vrot.slane %v3303_v22, %v348_v21  ;;  %v354_v26 = vrot.slane %v3303_v22, %v353_v23  ;;  %v360_v36 = vld [vmem:[%s3798_s3 + $0x20] sm:$0xff]  ;;  %v366_v40 = vld [vmem:[%s3798_s3 + $0x50] sm:$0xff]  ;;  %v365_v42 = vld [vmem:[%s3798_s3 + $0x48] sm:$0xff]  ;;  %s2563_s26 = sshll.u32 %s323_s25, 4  ;;  %s2564_s26 = int_to_ptr.vmem [resolvable:$true] %s2563_s26 }
  0x1a   : > { %2818 = vmatpush3.msra.mxu1 %v369_v13  ;;  %2786 = vmatprep.subr.mxu0 %v3147_v7  ;;  %v376_v37 = vld [vmem:[%s3798_s3 + $0xa0] sm:$0xff]  ;;  %v386_v41 = vld [vmem:[%s3798_s3 + $0xf0] sm:$0xff]  ;;  %v385_v43 = vld [vmem:[%s3798_s3 + $0xe8] sm:$0xff]  ;;  %s3085_s16 = scalar_lea.vmem %s2564_s26, 128  ;;  %p3092_p0 = scmp.lt.s32.totalorder %s2564_s26, %s3090_s13 }
  0x1b   : > { %2819 = vmatprep.subr.mxu1 %v3147_v7  ;;  %2787 = vmatpush3.msra.mxu0 %v356_v14  ;;  %v364_v44 = vld [vmem:[%s3798_s3 + $0x40] sm:$0xff]  ;;  %v375_v46 = vld [vmem:[%s3798_s3 + $0x98] sm:$0xff]  ;;  %v374_v48 = vld [vmem:[%s3798_s3 + $0x90] sm:$0xff]  ;;  %p3086_p11 = scmp.ne.s32.totalorder %s2564_s26, %s3085_s16  ;;  %p3093_p1 = scmp.lt.s32.totalorder %s3091_s21, %s3085_s16 }
  0x1c   : > { %2820 = vmatpush3.msra.mxu1 %v368_v15  ;;  %2788 = vmatprep.mubr.msk.f32.mxu0 %vm3148_vm1, %v3147_v7  ;;  %v384_v45 = vld [vmem:[%s3798_s3 + $0xe0] sm:$0xff]  ;;  %v395_v47 = vld [vmem:[%s3798_s3 + $0x138] sm:$0xff]  ;;  %v394_v49 = vld [vmem:[%s3798_s3 + $0x130] sm:$0xff] }
  0x1d   : > { %2791 = vmatprep.subr.mxu0 %v3147_v7  ;;  %2821 = vmatprep.mubr.msk.f32.mxu1 %vm3148_vm1, %v3147_v7  ;;  %v373_v50 = vld [vmem:[%s3798_s3 + $0x88] sm:$0xff]  ;;  %v372_v52 = vld [vmem:[%s3798_s3 + $0x80] sm:$0xff]  ;;  %v383_v54 = vld [vmem:[%s3798_s3 + $0xd8] sm:$0xff]  ;;  %p3087_p12 = pnand %p3086_p11, %p3238_p5  ;;  %p3094_p2 = por %p3093_p1, %p3092_p0 }
  0x1e   : > { %2835 = vmatprep.subr.mxu1 %v3147_v7  ;;  %v393_v51 = vld [vmem:[%s3798_s3 + $0x128] sm:$0xff]  ;;  %v392_v53 = vld [vmem:[%s3798_s3 + $0x120] sm:$0xff]  ;;  %v403_v55 = vld [vmem:[%s3798_s3 + $0x178] sm:$0xff] }
  0x1f   : > { %v382_v56 = vld [vmem:[%s3798_s3 + $0xd0] sm:$0xff]  ;;  %v381_v58 = vld [vmem:[%s3798_s3 + $0xc8] sm:$0xff]  ;;  %v380_v60 = vld [vmem:[%s3798_s3 + $0xc0] sm:$0xff]  ;;  %p3088_p13 = pneg %p3087_p12 }
  0x20   : > { %v402_v57 = vld [vmem:[%s3798_s3 + $0x170] sm:$0xff]  ;;  %v401_v59 = vld [vmem:[%s3798_s3 + $0x168] sm:$0xff]  ;;  %v400_v61 = vld [vmem:[%s3798_s3 + $0x160] sm:$0xff] }
  0x21   : > { %v391_v62 = vld [vmem:[%s3798_s3 + $0x118] sm:$0xff]  ;;  %v390_v63 = vld [vmem:[%s3798_s3 + $0x110] sm:$0xff]  ;;  %v389_v1 = vld [vmem:[%s3798_s3 + $0x108] sm:$0xff]  ;;  %p3095_p3 = pnand %p3094_p2, %p3088_p13 }
  0xa2   : > { %v335_v2 = vpop.xlane.xlu0 %334 }
  0xa3   : > { %v336_v3 = vmul.f32 0.03125, %v335_v2  ;;  %v388_v2 = vld [vmem:[%s3798_s3 + $0x100] sm:$0xff] }
  0xa5   : > { %v337_v4 = vsub.f32 %v3253_v0, %v336_v3  ;;  %v399_v3 = vld [vmem:[%s3798_s3 + $0x158] sm:$0xff] }
  0xa7   : > { %v338_v5 = vmul.f32 %v337_v4, %v337_v4 }
  0xa9   : > { %v339_v6 = vsel %vm332_vm0, %v338_v5, 0.0  ;;  %v397_v5 = vld [vmem:[%s3798_s3 + $0x148] sm:$0xff] }
  0xaa   : > { %340 = vadd.xlane.f32.xlu0 %v339_v6  ;;  %v396_v6 = vld [vmem:[%s3798_s3 + $0x140] sm:$0xff] }
 0x133   : > { %v341_v16 = vpop.xlane.xlu0 %340 }
 0x134   : > { %v342_v17 = vmul.f32 0.03125, %v341_v16  ;;  %v2631_v16 = vld [vmem:[%s3799_s4 + $0x3] ss:$0 sm:$0xff] }
 0x136   : > { %v343_v18 = vadd.f32 1e-05, %v342_v17  ;;  %v2635_v17 = vld [vmem:[%s3799_s4 + $0x7] ss:$0 sm:$0xff] }
 0x138   : > { %3059 = vrsqrt.f32 %v343_v18 }
 0x145   : > { %v3060_v25 = vpop.eup %3059 }
 0x146   : > { %v345_v27 = vmul.f32 %v3060_v25, %v337_v4  ;;  %v398_v4 = vld [vmem:[%s3798_s3 + $0x150] sm:$0xff] }
 0x148   : > { %v350_v28 = vmul.f32 %v349_v24, %v345_v27 }
 0x14a   : > { %v3312_v29 = vadd.f32 %v354_v26, %v350_v28 }
 0x14c   : > { %2789 = vmatmul.mubr.msk.f32.vlgmr.msra.gmra.mxu0 %vm332_vm0, %v3312_v29  ;;  %2822 = vmatmul.mubr.msk.f32.vlgmr.msra.gmra.mxu1 %vm332_vm0, %v3312_v29 }
 0x14d   : > { %2792 = vmatpush3.msra.mxu0 %v363_v30  ;;  %2836 = vmatpush3.msra.mxu1 %v379_v31  ;;  %v2632_v30 = vld [vmem:[%s3799_s4 + $0x4] ss:$0 sm:$0xff]  ;;  %v2637_v31 = vld [vmem:[%s3799_s4 + $0x9] ss:$0 sm:$0xff] }
 0x14e   : > { %2793 = vmatprep.subr.mxu0 %v3147_v7  ;;  %2837 = vmatprep.subr.mxu1 %v3147_v7 }
 0x14f   : > { %2794 = vmatpush3.msra.mxu0 %v362_v32  ;;  %2838 = vmatpush3.msra.mxu1 %v378_v33 }
 0x150   : > { %2795 = vmatprep.subr.mxu0 %v3147_v7  ;;  %2839 = vmatprep.subr.mxu1 %v3147_v7 }
 0x151   : > { %2796 = vmatpush3.msra.mxu0 %v361_v34  ;;  %2840 = vmatpush3.msra.mxu1 %v377_v35  ;;  %v2629_v34 = vld [vmem:[%s3799_s4 + $0x1] ss:$0 sm:$0xff] }
 0x152   : > { %2797 = vmatprep.subr.mxu0 %v3147_v7  ;;  %2841 = vmatprep.subr.mxu1 %v3147_v7 }
 0x153   : > { %2798 = vmatpush3.msra.mxu0 %v360_v36  ;;  %2799 = vmatprep.mubr.msk.f32.mxu0 %vm3148_vm1, %v3147_v7 }
 0x154   : > { %2842 = vmatpush3.msra.mxu1 %v376_v37  ;;  %2843 = vmatprep.mubr.msk.f32.mxu1 %vm3148_vm1, %v3147_v7  ;;  %v2633_v37 = vld [vmem:[%s3799_s4 + $0x5] ss:$0 sm:$0xff] }
 0x155   : > { %2800 = vmatmul.mubr.msk.f32.vlgmr.msra.gmra.mxu0 %vm332_vm0, %v3312_v29  ;;  %2802 = vmatprep.subr.mxu0 %v3147_v7 }
 0x156   : > { %2844 = vmatmul.mubr.msk.f32.vlgmr.msra.gmra.mxu1 %vm332_vm0, %v3312_v29  ;;  %2857 = vmatprep.subr.mxu1 %v3147_v7 }
 0x157   : > { %2803 = vmatpush3.msra.mxu0 %v367_v38  ;;  %2858 = vmatpush3.msra.mxu1 %v387_v39 }
 0x158   : > { %2804 = vmatprep.subr.mxu0 %v3147_v7  ;;  %2859 = vmatprep.subr.mxu1 %v3147_v7 }
 0x159   : > { %2805 = vmatpush3.msra.mxu0 %v366_v40  ;;  %2860 = vmatpush3.msra.mxu1 %v386_v41 }
 0x15a   : > { %2806 = vmatprep.subr.mxu0 %v3147_v7  ;;  %2861 = vmatprep.subr.mxu1 %v3147_v7 }
 0x15b   : > { %2807 = vmatpush3.msra.mxu0 %v365_v42  ;;  %2862 = vmatpush3.msra.mxu1 %v385_v43 }
 0x15c   : > { %2808 = vmatprep.subr.mxu0 %v3147_v7  ;;  %2863 = vmatprep.subr.mxu1 %v3147_v7 }
 0x15d   : > { %2809 = vmatpush3.msra.mxu0 %v364_v44  ;;  %2810 = vmatprep.mubr.msk.f32.mxu0 %vm3148_vm1, %v3147_v7  ;;  %v2630_v44 = vld [vmem:[%s3799_s4 + $0x2] ss:$0 sm:$0xff] }
 0x15e   : > { %2864 = vmatpush3.msra.mxu1 %v384_v45  ;;  %2865 = vmatprep.mubr.msk.f32.mxu1 %vm3148_vm1, %v3147_v7 }
 0x15f   : > { %2811 = vmatmul.mubr.msk.f32.vlgmr.msra.gmra.mxu0 %vm332_vm0, %v3312_v29  ;;  %2824 = vmatprep.subr.mxu0 %v3147_v7 }
 0x160   : > { %2866 = vmatmul.mubr.msk.f32.vlgmr.msra.gmra.mxu1 %vm332_vm0, %v3312_v29  ;;  %2879 = vmatprep.subr.mxu1 %v3147_v7 }
 0x161   : > { %2825 = vmatpush3.msra.mxu0 %v375_v46  ;;  %2880 = vmatpush3.msra.mxu1 %v395_v47  ;;  %v2634_v46 = vld [vmem:[%s3799_s4 + $0x6] ss:$0 sm:$0xff] }
 0x162   : > { %2826 = vmatprep.subr.mxu0 %v3147_v7  ;;  %2881 = vmatprep.subr.mxu1 %v3147_v7 }
 0x163   : > { %2827 = vmatpush3.msra.mxu0 %v374_v48  ;;  %2882 = vmatpush3.msra.mxu1 %v394_v49 }
 0x164   : > { %2828 = vmatprep.subr.mxu0 %v3147_v7  ;;  %2883 = vmatprep.subr.mxu1 %v3147_v7 }
 0x165   : > { %2829 = vmatpush3.msra.mxu0 %v373_v50  ;;  %2884 = vmatpush3.msra.mxu1 %v393_v51 }
 0x166   : > { %2830 = vmatprep.subr.mxu0 %v3147_v7  ;;  %2885 = vmatprep.subr.mxu1 %v3147_v7 }
 0x167   : > { %2831 = vmatpush3.msra.mxu0 %v372_v52  ;;  %2832 = vmatprep.mubr.msk.f32.mxu0 %vm3148_vm1, %v3147_v7 }
 0x168   : > { %2886 = vmatpush3.msra.mxu1 %v392_v53  ;;  %2887 = vmatprep.mubr.msk.f32.mxu1 %vm3148_vm1, %v3147_v7 }
 0x169   : > { %2833 = vmatmul.mubr.msk.f32.vlgmr.msra.gmra.mxu0 %vm332_vm0, %v3312_v29  ;;  %2846 = vmatprep.subr.mxu0 %v3147_v7 }
 0x16a   : > { %2888 = vmatmul.mubr.msk.f32.vlgmr.msra.gmra.mxu1 %vm332_vm0, %v3312_v29  ;;  %2901 = vmatprep.subr.mxu1 %v3147_v7 }
 0x16b   : > { %2847 = vmatpush3.msra.mxu0 %v383_v54  ;;  %2902 = vmatpush3.msra.mxu1 %v403_v55  ;;  %v2636_v54 = vld [vmem:[%s3799_s4 + $0x8] ss:$0 sm:$0xff] }
 0x16c   : > { %2848 = vmatprep.subr.mxu0 %v3147_v7  ;;  %2903 = vmatprep.subr.mxu1 %v3147_v7 }
 0x16d   : > { %2849 = vmatpush3.msra.mxu0 %v382_v56  ;;  %2904 = vmatpush3.msra.mxu1 %v402_v57 }
 0x16e   : > { %2850 = vmatprep.subr.mxu0 %v3147_v7  ;;  %2905 = vmatprep.subr.mxu1 %v3147_v7 }
 0x16f   : > { %2851 = vmatpush3.msra.mxu0 %v381_v58  ;;  %2906 = vmatpush3.msra.mxu1 %v401_v59 }
 0x170   : > { %2852 = vmatprep.subr.mxu0 %v3147_v7  ;;  %2907 = vmatprep.subr.mxu1 %v3147_v7 }
 0x171   : > { %2853 = vmatpush3.msra.mxu0 %v380_v60  ;;  %2854 = vmatprep.mubr.msk.f32.mxu0 %vm3148_vm1, %v3147_v7 }
 0x172   : > { %2908 = vmatpush3.msra.mxu1 %v400_v61  ;;  %2909 = vmatprep.mubr.msk.f32.mxu1 %vm3148_vm1, %v3147_v7 }
 0x173   : > { %2855 = vmatmul.mubr.msk.f32.vlgmr.msra.gmra.mxu0 %vm332_vm0, %v3312_v29  ;;  %2868 = vmatprep.subr.mxu0 %v3147_v7 }
 0x174   : > { %2910 = vmatmul.mubr.msk.f32.vlgmr.msra.gmra.mxu1 %vm332_vm0, %v3312_v29  ;;  %2869 = vmatpush3.msra.mxu0 %v391_v62  ;;  %v329_v62 = vld [vmem:[%s3796_s1] sm:$0xff] }
 0x175   : > { %2870 = vmatprep.subr.mxu0 %v3147_v7  ;;  %2876 = vmatprep.mubr.msk.f32.mxu0 %vm3148_vm1, %v3147_v7 }
 0x176   : > { %2871 = vmatpush3.msra.mxu0 %v390_v63  ;;  %2927 = vmatprep.subr.mxu1 %v3147_v7  ;;  %v1640_v63 = vsub.f32 1.0, %v329_v62 }
 0x177   : > { %2872 = vmatprep.subr.mxu0 %v3147_v7  ;;  %2929 = vmatprep.mubr.msk.f32.mxu1 %vm3148_vm1, %v3147_v7 }
 0x178   : > { %2873 = vmatpush3.msra.mxu0 %v389_v1 }
 0x179   : > { %2874 = vmatprep.subr.mxu0 %v3147_v7 }
 0x17a   : > { %2875 = vmatpush3.msra.mxu0 %v388_v2 }
 0x17b   : > { %2877 = vmatmul.mubr.msk.f32.vlgmr.msra.gmra.mxu0 %vm332_vm0, %v3312_v29  ;;  %2890 = vmatprep.subr.mxu0 %v3147_v7 }
 0x17c   : > { %2891 = vmatpush3.msra.mxu0 %v399_v3  ;;  %2898 = vmatprep.mubr.msk.f32.mxu0 %vm3148_vm1, %v3147_v7  ;;  %v1641_v3 = vmul.f32 -10000.0, %v1640_v63  ;;  %v1988_v63 = vld [vmem:[%s3800_s5 + $0x10] sm:$0xff] }
 0x17d   : > { %2892 = vmatprep.subr.mxu0 %v3147_v7 }
 0x17e   : > { %2893 = vmatpush3.msra.mxu0 %v398_v4 }
 0x17f   : > { %2894 = vmatprep.subr.mxu0 %v3147_v7 }
 0x180   : > { %2895 = vmatpush3.msra.mxu0 %v397_v5 }
 0x181   : > { %2896 = vmatprep.subr.mxu0 %v3147_v7 }
 0x182   : > { %2897 = vmatpush3.msra.mxu0 %v396_v6 }
 0x183   : > { %2899 = vmatmul.mubr.msk.f32.vlgmr.msra.gmra.mxu0 %vm332_vm0, %v3312_v29  ;;  %2912 = vmatprep.subr.mxu0 %v3147_v7  ;;  %v2628_v29 = vld [vmem:[%s3799_s4] ss:$0 sm:$0xff] }
 0x184   : > { %2914 = vmatprep.mubr.msk.f32.mxu0 %vm3148_vm1, %v3147_v7 }
 0x20c   : > { %v557_v8 = vpop.f32.mrf.mxu0  ;;  %v767_v9 = vpop.f32.mrf.mxu1 }
 0x20d   : > { %v768_v19 = vadd.f32 %v2631_v16, %v767_v9  ;;  %v558_v32 = vadd.f32 %v2628_v29, %v557_v8 }
 0x20e   : > { %v2790_v10 = vpop.f32.mrf.mxu0  ;;  %v2823_v11 = vpop.f32.mrf.mxu1 }
 0x20f   : > { %v1334_v28 = vmul.f32 0.35355338, %v768_v19  ;;  %v1331_v41 = vmul.f32 0.35355338, %v558_v32 }
 0x215   : > { %v627_v12 = vpop.f32.mrf.mxu0 }
 0x216   : > { %v907_v13 = vpop.f32.mrf.mxu1  ;;  %v628_v42 = vadd.f32 %v2629_v34, %v627_v12 }
 0x217   : > { %v2801_v14 = vpop.f32.mrf.mxu0  ;;  %v908_v43 = vadd.f32 %v2633_v37, %v907_v13 }
 0x218   : > { %v2845_v15 = vpop.f32.mrf.mxu1  ;;  %v1332_v45 = vmul.f32 0.35355338, %v628_v42 }
 0x21f   : > { %v697_v18 = vpop.f32.mrf.mxu0 }
 0x220   : > { %v1047_v24 = vpop.f32.mrf.mxu1  ;;  %v698_v47 = vadd.f32 %v2630_v44, %v697_v18 }
 0x221   : > { %v1048_v25 = vadd.f32 %v2635_v17, %v1047_v24  ;;  %v2812_v26 = vpop.f32.mrf.mxu0 }
 0x222   : > { %v2867_v27 = vpop.f32.mrf.mxu1  ;;  %v1333_v53 = vmul.f32 0.35355338, %v698_v47 }
 0x223   : > { %2928 = vmatpush3.xpose.msk.msra.mxu1 %vm1335_vm2, %v1048_v25 }
 0x224   : > { %2937 = vmatprep.subr.mxu1 %v3147_v7 }
 0x226   : > { %2930 = vmatmul.mubr.msk.f32.vlgmr.msra.gmra.mxu1 %vm1335_vm2, %v1334_v28 }
 0x227   : > { %2939 = vmatprep.mubr.msk.f32.mxu1 %vm3148_vm1, %v3147_v7 }
 0x229   : > { %v837_v33 = vpop.f32.mrf.mxu0 }
 0x22a   : > { %v838_v35 = vadd.f32 %v2632_v30, %v837_v33  ;;  %v1187_v36 = vpop.f32.mrf.mxu1 }
 0x22b   : > { %v1188_v38 = vadd.f32 %v2637_v31, %v1187_v36  ;;  %v2834_v39 = vpop.f32.mrf.mxu0 }
 0x22c   : > { %v2889_v40 = vpop.f32.mrf.mxu1  ;;  %2913 = vmatpush3.xpose.msk.msra.mxu0 %vm1335_vm2, %v838_v35 }
 0x22d   : > { %2938 = vmatpush3.msra.mxu1 %v1188_v38  ;;  %2917 = vmatprep.subr.mxu0 %v3147_v7 }
 0x22e   : > { %2947 = vmatprep.subr.mxu1 %v3147_v7 }
 0x22f   : > { %2915 = vmatmul.mubr.msk.f32.vlgmr.msra.gmra.mxu0 %vm1335_vm2, %v1331_v41 }
 0x230   : > { %2918 = vmatpush3.xpose.msk.msra.mxu0 %vm1335_vm2, %v908_v43  ;;  %2919 = vmatprep.mubr.msk.f32.mxu0 %vm3148_vm1, %v3147_v7 }
 0x231   : > { %2922 = vmatprep.subr.mxu0 %v3147_v7 }
 0x233   : > { %v977_v48 = vpop.f32.mrf.mxu0  ;;  %2920 = vmatmul.mubr.msk.f32.vlgmr.msra.gmra.mxu0 %vm1335_vm2, %v1332_v45 }
 0x234   : > { %v978_v49 = vadd.f32 %v2634_v46, %v977_v48  ;;  %v3563_v50 = vpop.f32.mrf.mxu1  ;;  %2924 = vmatprep.mubr.msk.f32.mxu0 %vm3148_vm1, %v3147_v7 }
 0x235   : > { %v2856_v51 = vpop.f32.mrf.mxu0 }
 0x236   : > { %v2911_v52 = vpop.f32.mrf.mxu1  ;;  %2923 = vmatpush3.xpose.msk.msra.mxu0 %vm1335_vm2, %v978_v49  ;;  %v2638_v49 = vld [vmem:[%s3799_s4 + $0xa] ss:$0 sm:$0xff] }
 0x237   : > { %2932 = vmatprep.subr.mxu0 %v3147_v7 }
 0x239   : > { %2925 = vmatmul.mubr.msk.f32.vlgmr.msra.gmra.mxu0 %vm1335_vm2, %v1333_v53 }
 0x23a   : > { %2934 = vmatprep.mubr.msk.f32.mxu0 %vm3148_vm1, %v3147_v7 }
 0x23b   : > { %v1117_v55 = vpop.f32.mrf.mxu0 }
 0x23c   : > { %v1118_v56 = vadd.f32 %v2636_v54, %v1117_v55  ;;  %v2639_v54 = vld [vmem:[%s3799_s4 + $0xb] ss:$0 sm:$0xff] }
 0x23d   : > { %v2878_v57 = vpop.f32.mrf.mxu0 }
 0x23e   : > { %2933 = vmatpush3.msra.mxu0 %v1118_v56  ;;  %v1328_v57 = vadd.f32 %v2639_v54, %v3563_v50  ;;  %v1986_v50 = vld [vmem:[%s3800_s5] sm:$0xff] }
 0x23f   : > { %2942 = vmatprep.subr.mxu0 %v3147_v7 }
 0x243   : > { %v3576_v58 = vpop.f32.mrf.mxu0 }
 0x244   : > { %v1258_v53 = vadd.f32 %v2638_v49, %v3576_v58 }
 0x245   : > { %v2900_v59 = vpop.f32.mrf.mxu0 }
 0x2e6   : > { %v1636_v60 = vpop.f32.mrf.mxu1 }
 0x2e7   : > { %v1645_v8 = vmul.f32 %v1636_v60, %v329_v62 }
 0x2e8   : > { %v2931_v61 = vpop.f32.mrf.mxu1 }
 0x2e9   : > { %v1649_v14 = vadd.f32 %v1645_v8, %v1641_v3 }
 0x2eb   : > { %v1659_v18 = vsel %vm1335_vm2, %v1649_v14, -inf }
 0x2ef   : > { %v1408_v1 = vpop.f32.mrf.mxu0 }
 0x2f0   : > { %v1642_v2 = vmul.f32 %v1408_v1, %v329_v62 }
 0x2f1   : > { %v2916_v4 = vpop.f32.mrf.mxu0 }
 0x2f2   : > { %v1646_v5 = vadd.f32 %v1642_v2, %v1641_v3 }
 0x2f3   : > { %v1484_v6 = vpop.f32.mrf.mxu0 }
 0x2f4   : > { %v1643_v9 = vmul.f32 %v1484_v6, %v329_v62  ;;  %v1650_v10 = vsel %vm1335_vm2, %v1646_v5, -inf }
 0x2f5   : > { %1651 = vmax.xlane.f32.xlu1 %v1650_v10  ;;  %v2921_v11 = vpop.f32.mrf.mxu0 }
 0x2f6   : > { %v1647_v12 = vadd.f32 %v1643_v9, %v1641_v3 }
 0x2f8   : > { %v1653_v13 = vsel %vm1335_vm2, %v1647_v12, -inf }
 0x2f9   : > { %v1560_v15 = vpop.f32.mrf.mxu0  ;;  %1654 = vmax.xlane.f32.xlu1 %v1653_v13 }
 0x2fa   : > { %v1644_v16 = vmul.f32 %v1560_v15, %v329_v62  ;;  %v1987_v62 = vld [vmem:[%s3800_s5 + $0x8] sm:$0xff] }
 0x2fb   : > { %v2926_v17 = vpop.f32.mrf.mxu0 }
 0x2fc   : > { %v1648_v19 = vadd.f32 %v1644_v16, %v1641_v3  ;;  %v1989_v3 = vld [vmem:[%s3800_s5 + $0x18] sm:$0xff] }
 0x2fd   : > { %1660 = vmax.xlane.f32.xlu1 %v1659_v18  ;;  %v3644_v18 = vld [vmem:[%s3797_s2 + $0x8] sm:$0x3] }
 0x2fe   : > { %v1656_v24 = vsel %vm1335_vm2, %v1648_v19, -inf }
 0x2ff   : > { %1657 = vmax.xlane.f32.xlu0 %v1656_v24 }
 0x37e   : > { %v1652_v25 = vpop.xlane.xlu1 %1651 }
 0x37f   : > { %v1662_v26 = vsub.f32 %v1646_v5, %v1652_v25 }
 0x381   : > { %v1666_v27 = vmul.f32 1.442695, %v1662_v26 }
 0x382   : > { %v1655_v28 = vpop.xlane.xlu1 %1654 }
 0x383   : > { %3061 = vpow2.f32 %v1666_v27  ;;  %v1663_v29 = vsub.f32 %v1647_v12, %v1655_v28 }
 0x385   : > { %v1668_v30 = vmul.f32 1.442695, %v1663_v29  ;;  %v2292_v29 = vrot.slane %v3644_v18, %v348_v21  ;;  %v2309_v21 = vsub.s32 2, %v3297_v20 }
 0x386   : > { %v1661_v31 = vpop.xlane.xlu1 %1660 }
 0x387   : > { %3063 = vpow2.f32 %v1668_v30  ;;  %v1665_v32 = vsub.f32 %v1649_v14, %v1661_v31 }
 0x388   : > { %v1658_v33 = vpop.xlane.xlu0 %1657 }
 0x389   : > { %v1672_v34 = vmul.f32 1.442695, %v1665_v32  ;;  %v1664_v35 = vsub.f32 %v1648_v19, %v1658_v33 }
 0x38b   : > { %3065 = vpow2.f32 %v1672_v34  ;;  %v1670_v36 = vmul.f32 1.442695, %v1664_v35 }
 0x38d   : > { %3067 = vpow2.f32 %v1670_v36 }
 0x390   : > { %v3062_v37 = vpop.eup %3061 }
 0x391   : > { %v1674_v38 = vsel %vm1335_vm2, %v3062_v37, 0.0 }
 0x392   : > { %1675 = vadd.xlane.f32.xlu0 %v1674_v38 }
 0x394   : > { %v3064_v39 = vpop.eup %3063 }
 0x395   : > { %v1677_v40 = vsel %vm1335_vm2, %v3064_v39, 0.0 }
 0x396   : > { %1678 = vadd.xlane.f32.xlu1 %v1677_v40 }
 0x398   : > { %v3066_v41 = vpop.eup %3065 }
 0x399   : > { %v1683_v42 = vsel %vm1335_vm2, %v3066_v41, 0.0 }
 0x39a   : > { %v3068_v43 = vpop.eup %3067  ;;  %1684 = vadd.xlane.f32.xlu1 %v1683_v42  ;;  %v2314_v42 = vsub.s32 3, %v3297_v20 }
 0x39b   : > { %v1680_v44 = vsel %vm1335_vm2, %v3068_v43, 0.0 }
 0x39c   : > { %1681 = vadd.xlane.f32.xlu0 %v1680_v44 }
 0x41b   : > { %v1676_v45 = vpop.xlane.xlu0 %1675 }
 0x41c   : > { %3069 = vrcp.f32 %v1676_v45 }
 0x41f   : > { %v1679_v46 = vpop.xlane.xlu1 %1678 }
 0x420   : > { %3071 = vrcp.f32 %v1679_v46  ;;  %v2315_v46 = vrot.slane %v3303_v22, %v2314_v42 }
 0x423   : > { %v1685_v47 = vpop.xlane.xlu1 %1684 }
 0x424   : > { %3073 = vrcp.f32 %v1685_v47 }
 0x425   : > { %v1682_v48 = vpop.xlane.xlu0 %1681 }
 0x426   : > { %3075 = vrcp.f32 %v1682_v48 }
 0x429   : > { %v3070_v51 = vpop.eup %3069 }
 0x42a   : > { %v1690_v52 = vmul.f32 %v3070_v51, %v3062_v37 }
 0x42c   : > { %2935 = vmatmul.mubr.msk.f32.vlgmr.msra.gmra.mxu0 %vm1335_vm2, %v1690_v52 }
 0x42d   : > { %v3072_v55 = vpop.eup %3071  ;;  %2943 = vmatpush3.msra.mxu0 %v1258_v53  ;;  %2944 = vmatprep.mubr.msk.f32.mxu0 %vm3148_vm1, %v3147_v7 }
 0x42e   : > { %v1691_v56 = vmul.f32 %v3072_v55, %v3064_v39  ;;  %2952 = vmatprep.subr.mxu0 %v3147_v7 }
 0x430   : > { %2940 = vmatmul.mubr.msk.f32.vlgmr.msra.gmra.mxu1 %vm1335_vm2, %v1691_v56 }
 0x431   : > { %v3074_v59 = vpop.eup %3073  ;;  %2948 = vmatpush3.msra.mxu1 %v1328_v57  ;;  %2949 = vmatprep.mubr.msk.f32.mxu1 %vm3148_vm1, %v3147_v7  ;;  %v2344_v57 = vld [vmem:[%s3801_s6 + $0x18] sm:$0xff] }
 0x432   : > { %v1693_v58 = vmul.f32 %v3074_v59, %v3066_v41  ;;  %2957 = vmatprep.subr.mxu1 %v3147_v7  ;;  %v2342_v59 = vld [vmem:[%s3801_s6 + $0x8] sm:$0xff] }
 0x433   : > { %v3076_v60 = vpop.eup %3075 }
 0x434   : > { %v1692_v61 = vmul.f32 %v3076_v60, %v3068_v43  ;;  %2950 = vmatmul.mubr.msk.f32.vlgmr.msra.gmra.mxu1 %vm1335_vm2, %v1693_v58  ;;  %v2310_v43 = vrot.slane %v3303_v22, %v2309_v21  ;;  %v2341_v58 = vld [vmem:[%s3801_s6] sm:$0xff]  ;;  %v2449_v60 = vld [vmem:[%s3803_s8 + $0x78] sm:$0xff] }
 0x435   : > { %2959 = vmatprep.mubr.msk.f32.mxu1 %vm3148_vm1, %v3147_v7  ;;  %2958 = vmatpush3.msra.mxu1 %v1987_v62 }
 0x436   : > { %2945 = vmatmul.mubr.msk.f32.vlgmr.msra.gmra.mxu0 %vm1335_vm2, %v1692_v61  ;;  %2967 = vmatprep.subr.mxu1 %v3147_v7 }
 0x437   : > { %2954 = vmatprep.mubr.msk.f32.mxu0 %vm3148_vm1, %v3147_v7  ;;  %2953 = vmatpush3.msra.mxu0 %v1986_v50 }
 0x438   : > { %2962 = vmatprep.subr.mxu0 %v3147_v7 }
 0x4ec   : > { %v1763_v1 = vpop.f32.mrf.mxu0 }
 0x4ed   : > { %2955 = vmatmul.mubr.msk.f32.vlgmr.msra.gmra.mxu0 %vm1335_vm2, %v1763_v1  ;;  %v2338_v1 = vsub.s32 5, %v3297_v20 }
 0x4ee   : > { %v2936_v2 = vpop.f32.mrf.mxu0  ;;  %2963 = vmatpush3.msra.mxu0 %v1988_v63  ;;  %2964 = vmatprep.mubr.msk.f32.mxu0 %vm3148_vm1, %v3147_v7  ;;  %v2333_v63 = vsub.s32 4, %v3297_v20 }
 0x4ef   : > { %2972 = vmatprep.subr.mxu0 %v3147_v7 }
 0x4f0   : > { %v1836_v4 = vpop.f32.mrf.mxu1  ;;  %v2334_v2 = vrot.slane %v3303_v22, %v2333_v63 }
 0x4f1   : > { %2960 = vmatmul.mubr.msk.f32.vlgmr.msra.gmra.mxu1 %vm1335_vm2, %v1836_v4 }
 0x4f2   : > { %v2941_v5 = vpop.f32.mrf.mxu1  ;;  %2968 = vmatpush3.msra.mxu1 %v1989_v3  ;;  %2969 = vmatprep.mubr.msk.f32.mxu1 %vm3148_vm1, %v3147_v7 }
 0x4f3   : > { %2983 = vmatprep.subr.mxu1 %v3147_v7  ;;  %v2339_v5 = vrot.slane %v3303_v22, %v2338_v1 }
 0x4f4   : > { %v1982_v6 = vpop.f32.mrf.mxu1 }
 0x4f5   : > { %2970 = vmatmul.mubr.msk.f32.vlgmr.msra.gmra.mxu1 %vm1335_vm2, %v1982_v6 }
 0x4f6   : > { %v1909_v8 = vpop.f32.mrf.mxu0  ;;  %v2951_v9 = vpop.f32.mrf.mxu1  ;;  %3015 = vmatprep.mubr.msk.f32.mxu1 %vm3148_vm1, %v3147_v7  ;;  %2984 = vmatpush3.msra.mxu1 %v2449_v60 }
 0x4f7   : > { %2965 = vmatmul.mubr.msk.f32.vlgmr.msra.gmra.mxu0 %vm1335_vm2, %v1909_v8  ;;  %2985 = vmatprep.subr.mxu1 %v3147_v7  ;;  %v2448_v9 = vld [vmem:[%s3803_s8 + $0x70] sm:$0xff] }
 0x4f8   : > { %v2946_v10 = vpop.f32.mrf.mxu0  ;;  %2980 = vmatprep.mubr.msk.f32.mxu0 %vm3148_vm1, %v3147_v7  ;;  %2973 = vmatpush3.msra.mxu0 %v2344_v57 }
 0x4f9   : > { %2974 = vmatprep.subr.mxu0 %v3147_v7  ;;  %2986 = vmatpush3.msra.mxu1 %v2448_v9  ;;  %v2447_v10 = vld [vmem:[%s3803_s8 + $0x68] sm:$0xff] }
 0x4fa   : > { %2987 = vmatprep.subr.mxu1 %v3147_v7 }
 0x4fb   : > { %2988 = vmatpush3.msra.mxu1 %v2447_v10 }
 0x4fc   : > { %2989 = vmatprep.subr.mxu1 %v3147_v7 }
 0x5ad   : > { %v2059_v11 = vpop.f32.mrf.mxu0 }
 0x5ae   : > { %v2282_v17 = vsel %vm332_vm0, %v2059_v11, 0.0  ;;  %v2446_v11 = vld [vmem:[%s3803_s8 + $0x60] sm:$0xff] }
 0x5af   : > { %v2956_v12 = vpop.f32.mrf.mxu0  ;;  %2990 = vmatpush3.msra.mxu1 %v2446_v11 }
 0x5b0   : > { %2991 = vmatprep.subr.mxu1 %v3147_v7  ;;  %v2445_v12 = vld [vmem:[%s3803_s8 + $0x58] sm:$0xff] }
 0x5b1   : > { %v2132_v13 = vpop.f32.mrf.mxu1  ;;  %2992 = vmatpush3.msra.mxu1 %v2445_v12 }
 0x5b2   : > { %v2283_v15 = vsel %vm332_vm0, %v2132_v13, 0.0  ;;  %2993 = vmatprep.subr.mxu1 %v3147_v7  ;;  %v2444_v13 = vld [vmem:[%s3803_s8 + $0x50] sm:$0xff] }
 0x5b3   : > { %v2961_v14 = vpop.f32.mrf.mxu1  ;;  %v2284_v19 = vadd.f32 %v2283_v15, %v2282_v17  ;;  %2994 = vmatpush3.msra.mxu1 %v2444_v13  ;;  %v2442_v15 = vld [vmem:[%s3803_s8 + $0x40] sm:$0xff]  ;;  %v2440_v17 = vld [vmem:[%s3803_s8 + $0x30] sm:$0xff] }
 0x5b4   : > { %2995 = vmatprep.subr.mxu1 %v3147_v7  ;;  %v2443_v14 = vld [vmem:[%s3803_s8 + $0x48] sm:$0xff] }
 0x5b5   : > { %v2278_v16 = vpop.f32.mrf.mxu1  ;;  %2996 = vmatpush3.msra.mxu1 %v2443_v14 }
 0x5b6   : > { %v2287_v30 = vsel %vm332_vm0, %v2278_v16, 0.0  ;;  %2997 = vmatprep.subr.mxu1 %v3147_v7  ;;  %v2441_v16 = vld [vmem:[%s3803_s8 + $0x38] sm:$0xff] }
 0x5b7   : > { %v2205_v24 = vpop.f32.mrf.mxu0  ;;  %v2971_v25 = vpop.f32.mrf.mxu1  ;;  %2998 = vmatpush3.msra.mxu1 %v2442_v15 }
 0x5b8   : > { %v2285_v26 = vsel %vm332_vm0, %v2205_v24, 0.0  ;;  %2999 = vmatprep.subr.mxu1 %v3147_v7  ;;  %v2438_v24 = vld [vmem:[%s3803_s8 + $0x20] sm:$0xff]  ;;  %v2437_v25 = vld [vmem:[%s3803_s8 + $0x18] sm:$0xff] }
 0x5b9   : > { %v2286_v27 = vadd.f32 %v2285_v26, %v2284_v19  ;;  %v2966_v28 = vpop.f32.mrf.mxu0  ;;  %3000 = vmatpush3.msra.mxu1 %v2441_v16  ;;  %v2439_v19 = vld [vmem:[%s3803_s8 + $0x28] sm:$0xff]  ;;  %v2436_v26 = vld [vmem:[%s3803_s8 + $0x10] sm:$0xff] }
 0x5ba   : > { %3001 = vmatprep.subr.mxu1 %v3147_v7  ;;  %v2434_v28 = vld [vmem:[%s3803_s8] sm:$0xff] }
 0x5bb   : > { %v2288_v31 = vadd.f32 %v2287_v30, %v2286_v27  ;;  %3002 = vmatpush3.msra.mxu1 %v2440_v17  ;;  %v2435_v27 = vld [vmem:[%s3803_s8 + $0x8] sm:$0xff] }
 0x5bc   : > { %3003 = vmatprep.subr.mxu1 %v3147_v7 }
 0x5bd   : > { %v2293_v32 = vadd.f32 %v2292_v29, %v2288_v31  ;;  %3004 = vmatpush3.msra.mxu1 %v2439_v19  ;;  %v2668_v29 = vld [vmem:[%s3802_s7] ss:$0 sm:$0xff] }
 0x5be   : > { %3005 = vmatprep.subr.mxu1 %v3147_v7 }
 0x5bf   : > { %v2294_v33 = vsel %vm332_vm0, %v2293_v32, 0.0  ;;  %3006 = vmatpush3.msra.mxu1 %v2438_v24 }
 0x5c0   : > { %2295 = vadd.xlane.f32.xlu0 %v2294_v33  ;;  %3007 = vmatprep.subr.mxu1 %v3147_v7 }
 0x5c1   : > { %3008 = vmatpush3.msra.mxu1 %v2437_v25 }
 0x5c2   : > { %3009 = vmatprep.subr.mxu1 %v3147_v7 }
 0x5c3   : > { %3010 = vmatpush3.msra.mxu1 %v2436_v26 }
 0x5c4   : > { %3011 = vmatprep.subr.mxu1 %v3147_v7 }
 0x5c5   : > { %3012 = vmatpush3.msra.mxu1 %v2435_v27 }
 0x5c6   : > { %3013 = vmatprep.subr.mxu1 %v3147_v7 }
 0x5c7   : > { %3014 = vmatpush3.msra.mxu1 %v2434_v28 }
 0x649   : > { %v2296_v34 = vpop.xlane.xlu0 %2295 }
 0x64a   : > { %v2297_v35 = vmul.f32 0.03125, %v2296_v34 }
 0x64c   : > { %v2298_v36 = vsub.f32 %v2293_v32, %v2297_v35 }
 0x64e   : > { %v2299_v37 = vmul.f32 %v2298_v36, %v2298_v36 }
 0x650   : > { %v2300_v38 = vsel %vm332_vm0, %v2299_v37, 0.0 }
 0x651   : > { %2301 = vadd.xlane.f32.xlu1 %v2300_v38 }
 0x6da   : > { %v2302_v39 = vpop.xlane.xlu1 %2301 }
 0x6db   : > { %v2303_v40 = vmul.f32 0.03125, %v2302_v39 }
 0x6dd   : > { %v2304_v41 = vadd.f32 1e-05, %v2303_v40 }
 0x6df   : > { %3077 = vrsqrt.f32 %v2304_v41 }
 0x6ec   : > { %v3078_v44 = vpop.eup %3077 }
 0x6ed   : > { %v2306_v45 = vmul.f32 %v3078_v44, %v2298_v36 }
 0x6ef   : > { %v2311_v47 = vmul.f32 %v2310_v43, %v2306_v45 }
 0x6f1   : > { %v2316_v48 = vadd.f32 %v2315_v46, %v2311_v47 }
 0x6f3   : > { %v3658_v49 = vadd.f32 %v2316_v48, %v3253_v0  ;;  %v2343_v0 = vld [vmem:[%s3801_s6 + $0x10] sm:$0xff] }
 0x6f4   : > { %2975 = vmatpush3.msra.mxu0 %v2343_v0 }
 0x6f5   : > { %v2318_v51 = vsel %vm332_vm0, %v3658_v49, 0.0  ;;  %2976 = vmatprep.subr.mxu0 %v3147_v7 }
 0x6f6   : > { %2319 = vadd.xlane.f32.xlu0 %v2318_v51  ;;  %2977 = vmatpush3.msra.mxu0 %v2342_v59 }
 0x6f7   : > { %2978 = vmatprep.subr.mxu0 %v3147_v7  ;;  %v2453_v7 = vrot.slane %v3644_v18, %v353_v23  ;;  %v2539_v23 = vsub.s32 6, %v3297_v20  ;;  %v2544_v18 = vsub.s32 7, %v3297_v20 }
 0x6f8   : > { %2979 = vmatpush3.msra.mxu0 %v2341_v58 }
 0x6f9   : > { %v2545_v0 = vrot.slane %v3303_v22, %v2544_v18 }
 0x77f   : > { %v2320_v52 = vpop.xlane.xlu0 %2319 }
 0x780   : > { %v2321_v53 = vmul.f32 0.03125, %v2320_v52 }
 0x782   : > { %v2322_v54 = vsub.f32 %v3658_v49, %v2321_v53 }
 0x784   : > { %v2323_v55 = vmul.f32 %v2322_v54, %v2322_v54 }
 0x786   : > { %v2324_v56 = vsel %vm332_vm0, %v2323_v55, 0.0  ;;  %v2540_v55 = vrot.slane %v3303_v22, %v2539_v23 }
 0x787   : > { %2325 = vadd.xlane.f32.xlu1 %v2324_v56 }
 0x810   : > { %v2326_v61 = vpop.xlane.xlu1 %2325 }
 0x811   : > { %v2327_v50 = vmul.f32 0.03125, %v2326_v61 }
 0x813   : > { %v2328_v62 = vadd.f32 1e-05, %v2327_v50 }
 0x815   : > { %3079 = vrsqrt.f32 %v2328_v62 }
 0x822   : > { %v3080_v3 = vpop.eup %3079 }
 0x823   : > { %v2330_v4 = vmul.f32 %v3080_v3, %v2322_v54 }
 0x825   : > { %v2335_v6 = vmul.f32 %v2334_v2, %v2330_v4 }
 0x827   : > { %v2340_v8 = vadd.f32 %v2339_v5, %v2335_v6 }
 0x829   : > { %2981 = vmatmul.mubr.msk.f32.vlgmr.msra.gmra.mxu0 %vm332_vm0, %v2340_v8 }
 0x8e9   : > { %v2421_v30 = vpop.f32.mrf.mxu0 }
 0x8ea   : > { %v2422_v31 = vadd.f32 %v2668_v29, %v2421_v30 }
 0x8eb   : > { %v2982_v32 = vpop.f32.mrf.mxu0 }
 0x8ec   : > { %v2427_v33 = vmul.f32 0.044715, %v2422_v31  ;;  %v2426_v35 = vmul.f32 0.7978846, %v2422_v31  ;;  %v2425_v39 = vmul.f32 0.5, %v2422_v31 }
 0x8ee   : > { %v2428_v34 = vmul.f32 %v2427_v33, %v2422_v31 }
 0x8f0   : > { %v2429_v36 = vadd.f32 1.0, %v2428_v34 }
 0x8f2   : > { %v2430_v37 = vmul.f32 %v2429_v36, %v2426_v35 }
 0x8f4   : > { %3081 = vtanh.f32 %v2430_v37 }
 0x901   : > { %v3082_v38 = vpop.eup %3081 }
 0x902   : > { %v2432_v40 = vadd.f32 1.0, %v3082_v38 }
 0x904   : > { %v2433_v41 = vmul.f32 %v2432_v40, %v2425_v39 }
 0x906   : > { %3016 = vmatmul.mubr.f32.vlgmr.msra.gmra.mxu1 %v2433_v41 }
 0x9c6   : > { %v2520_v21 = vpop.f32.mrf.mxu1 }
 0x9c7   : > { %v2521_v42 = vadd.f32 %v2520_v21, %v2453_v7 }
 0x9c8   : > { %v3017_v43 = vpop.f32.mrf.mxu1 }
 0x9c9   : > { %v2524_v44 = vsel %vm332_vm0, %v2521_v42, 0.0 }
 0x9ca   : > { %2525 = vadd.xlane.f32.xlu0 %v2524_v44 }
 0xa53   : > { %v2526_v45 = vpop.xlane.xlu0 %2525 }
 0xa54   : > { %v2527_v46 = vmul.f32 0.03125, %v2526_v45 }
 0xa56   : > { %v2528_v47 = vsub.f32 %v2521_v42, %v2527_v46 }
 0xa58   : > { %v2529_v48 = vmul.f32 %v2528_v47, %v2528_v47 }
 0xa5a   : > { %v2530_v51 = vsel %vm332_vm0, %v2529_v48, 0.0 }
 0xa5b   : > { %2531 = vadd.xlane.f32.xlu1 %v2530_v51 }
 0xae4   : > { %v2532_v52 = vpop.xlane.xlu1 %2531 }
 0xae5   : > { %v2533_v53 = vmul.f32 0.03125, %v2532_v52 }
 0xae7   : > { %v2534_v54 = vadd.f32 1e-05, %v2533_v53 }
 0xae9   : > { %3083 = vrsqrt.f32 %v2534_v54 }
 0xaf6   : > { %v3084_v56 = vpop.eup %3083 }
 0xaf7   : > { %v2536_v57 = vmul.f32 %v3084_v56, %v2528_v47 }
 0xaf9   : > { %v2541_v59 = vmul.f32 %v2540_v55, %v2536_v57 }
 0xafb   : > { %v2546_v58 = vadd.f32 %v2545_v0, %v2541_v59 }
 0xafd   : > { %v2547_v60 = vadd.f32 %v2546_v58, %v3658_v49 }
 0xaff   : > { %2548 = vst.msk [vmem:[%s323_s25] sm:$0xff] %vm332_vm0, %v2547_v60 }
 0xb00   : > { %3098 = shalt.err (!%p3095_p3)
}
 0xb01   : > { %s3099_s23 = scalar_lea.hbm %s2561_s29, 128  ;;  %s3103_s25 = scalar_lea.hbm %s3804_s9, 256 }
 0xb02   : > { %p3100_p4 = scmp.ne.s32.totalorder %s2561_s29, %s3099_s23  ;;  %p3104_p9 = scmp.lt.s32.totalorder %s2561_s29, %s3804_s9 }
 0xb03   : > { %p3105_p10 = scmp.lt.s32.totalorder %s3103_s25, %s3099_s23 }
 0xb04   : > { %p3101_p7 = pnand %p3100_p4, %p3238_p5 }
 0xb05   : > { %p3106_p11 = por %p3105_p10, %p3104_p9 }
 0xb06   : > { %p3102_p8 = pneg %p3101_p7 }
 0xb08   : > { %p3107_p12 = pnand %p3106_p11, %p3102_p8 }
 0xb0a   : > { %3110 = shalt.err (!%p3107_p12)
}
 0xb0b   : > { %3018 = dma.vmem_to_hbm [thread:$0]  (%p3238_p5), %s2564_s26, 128, %s2561_s29, %s2550_s14  }
 0xb0c PF: > { %p3024_p13 = scmp.ge.s32.totalorder %s3145_s12, 2  ;;  %s2575_s16 = sand.u32 1, %s3133_s30  }
 0xb0d   : > { %s2576_s17 = scalar_lea.sflag [#allocation3], %s2575_s16 }
 0xb0e   : > { %p3021_p0 = pnand %p3024_p13, %p3242_p6 }
 0xb10   : > { %p3022_p1 = pneg %p3021_p0 }
 0xb12   : > { %3128 = dma.done.wait (%p3022_p1), %s2576_s17, 128  }
 0xb13   : > { %3130 = vsyncadd (%p3022_p1), %s2576_s17, 4294967168  ;;  %p19_p2 = scmp.ge.s32.totalorder %s3225_s15, 4   ;;  %s3807_s30 = smov %s3137_s10 }
 0xb14   : > { %s3808_s10 = smov %s3141_s11  ;;  %s3809_s11 = smov %s3236_s18 }
 0xb15   : > { %s3810_s12 = smov %s3225_s15  ;;  %21 = sbr.rel (!%p19_p2) target bundleno = 3 (0x3), region = 91 }
 0xb1a   :  { %2581 = vsyncpa [#allocation3], 1 }
 0xb1b   :  { %2583 = vsyncpa [#allocation3 + $0x1], 1 }

</bundles_post_ra>
